<compile_context>
chip_gen: v7x
topology: tpu7x:2x2x1
jax: 0.10.0
libtpu: 0.0.40
codegen_flags: <defaults>
</compile_context>

<pallas_src>
import functools

import jax
import jax.numpy as jnp
from jax.experimental import pallas as pl
from jax.experimental.pallas import tpu as pltpu


def _round_up(x, m):
    return (x + m - 1) // m * m


def _ms_loss_kernel(nclass_ref, rows_ref, cols_ref,   # scalar prefetch (SMEM)
                    invcnt_ref,                       # (1, C_pad) f32 : 1/max(count_c,1)
                    e_row_ref, e_col_ref,             # (TB, D) embedding tiles
                    lbl_row_ref, lbl_col_ref,         # (TB, 1) int32 label tiles
                    lblT_col_ref,                     # (1, TB) int32 col labels (lane)
                    out_ref,                          # (1, 1) f32 output
                    posdiag_acc,                      # VMEM scratch (1, C_pad) f32
                    n_acc,                            # VMEM scratch (C_pad, C_pad) f32
                    *, alpha, beta, base, c_pad, mxu_dtype):
    t = pl.program_id(0)
    nsteps = pl.num_programs(0)
    i = rows_ref[t]
    j = cols_ref[t]

    @pl.when(t == 0)
    def _init():
        posdiag_acc[...] = jnp.zeros_like(posdiag_acc)
        n_acc[...] = jnp.zeros_like(n_acc)

    eps = 1e-12

    def _normalize(e):
        # torch.nn.functional.normalize(x, dim=1, eps=1e-12), via rsqrt (EUP)
        e = e.astype(jnp.float32)
        sumsq = jnp.sum(e * e, axis=1, keepdims=True)
        return e * jax.lax.rsqrt(jnp.maximum(sumsq, eps * eps))

    e_i = _normalize(e_row_ref[...])          # (TB, D) f32
    e_j = _normalize(e_col_ref[...])          # (TB, D) f32

    # cos tile = E_i @ E_j.T without an explicit transpose (contract dim 1 of both)
    cos = jax.lax.dot_general(
        e_i.astype(mxu_dtype), e_j.astype(mxu_dtype),
        dimension_numbers=(((1,), (1,)), ((), ())),
        preferred_element_type=jnp.float32)   # (TB, TB)

    # Fused logit: the pos term only reads same-label pairs and the neg term
    # only reads the (masked-off-diagonal) cross-label pairs, so one exp works
    # for both.  The (wrong) same-label values landing on diag(N) are masked
    # out at finalize and never observed.
    same = lbl_row_ref[...] == lblT_col_ref[...]          # (TB, TB) bool
    coef = jnp.where(same, -alpha, beta)                  # (TB, TB) f32
    logit = jnp.exp(coef * (cos - base))                  # (TB, TB) f32

    # Build normalized one-hot class-mask tiles in-kernel (no HBM target_mask).
    inv_cnt = invcnt_ref[...]                                       # (1, C_pad)
    cls_iota = jax.lax.broadcasted_iota(jnp.int32, (1, c_pad), 1)   # (1, C_pad)
    tn_i = jnp.where(lbl_row_ref[...] == cls_iota, inv_cnt, 0.0)    # (TB, C_pad)
    tn_j = jnp.where(lbl_col_ref[...] == cls_iota, inv_cnt, 0.0)    # (TB, C_pad)

    # Symmetry weighting: only j >= i blocks are visited.  Diag blocks get 1/2
    # so that diag(P) = 2 * posdiag_acc and N = n_acc + n_acc.T at finalize.
    w = jnp.where(i == j, 0.5, 1.0).astype(jnp.float32)
    tn_i_w = tn_i * w

    r = jnp.dot(logit, tn_j, preferred_element_type=jnp.float32)    # (TB, C_pad)
    posdiag_acc[...] += jnp.sum(tn_i_w * r, axis=0, keepdims=True)  # (1, C_pad)
    n_acc[...] += jax.lax.dot_general(
        tn_i_w, r, dimension_numbers=(((0,), (0,)), ((), ())),
        preferred_element_type=jnp.float32)                         # (C_pad, C_pad)

    @pl.when(t == nsteps - 1)
    def _finalize():
        nclass = nclass_ref[0].astype(jnp.float32)
        # posdiag_acc == diag(P)/2, so 1 + posdiag_acc == 1 + P_cc/2.
        # Padded / absent classes contribute log(1 + 0) = 0.
        pos_term = jnp.sum(jnp.log(1.0 + posdiag_acc[...]), keepdims=True)  # (1,1)
        n_full = n_acc[...] + n_acc[...].T                                  # N (sym)
        row = jax.lax.broadcasted_iota(jnp.int32, (c_pad, c_pad), 0)
        col = jax.lax.broadcasted_iota(jnp.int32, (c_pad, c_pad), 1)
        off_diag = (row != col).astype(jnp.float32)
        neg_term = jnp.sum(jnp.log(1.0 + n_full * off_diag), keepdims=True)  # (1,1)
        out_ref[...] = (pos_term / (alpha * nclass)
                        + neg_term / (2.0 * beta * nclass))


def classwise_multisimilarity_loss(embeddings, labels, num_label_vocab,
                                   alpha, beta, base, *,
                                   max_tile=512, mxu_dtype=jnp.float32):
    """embeddings: (B, D) float (any dtype), labels: (B,) int in [0, num_label_vocab)."""
    B, D = embeddings.shape
    labels = labels.astype(jnp.int32)

    # Lane-aligned class dim.
    c_pad = _round_up(max(int(num_label_vocab), 1), 128)

    # Tile the batch: single tile if it fits; otherwise 128-multiple tiles so
    # the (1, TB) lane-dense label stream is a legal block.
    b_pad8 = _round_up(B, 8)
    if b_pad8 <= max_tile:
        tb = b_pad8
    else:
        tb = _round_up(min(int(max_tile), b_pad8), 128)
    b_pad = _round_up(B, tb)
    nt = b_pad // tb

    # Cheap O(B) wrapper-side prep: per-class counts, #classes present.
    counts = jnp.zeros((num_label_vocab,), jnp.float32).at[labels].add(1.0)
    nclass = jnp.sum((counts > 0.0).astype(jnp.int32)).reshape(1)
    inv_count = (1.0 / jnp.maximum(counts, 1.0)).astype(jnp.float32)
    inv_count = jnp.pad(inv_count, (0, c_pad - num_label_vocab)).reshape(1, c_pad)

    emb = embeddings              # keep native dtype; kernel casts
    lbl = labels
    if b_pad != B:
        emb = jnp.pad(emb, ((0, b_pad - B), (0, 0)))
        lbl = jnp.pad(lbl, (0, b_pad - B), constant_values=-1)   # matches no class
    lbl2d = lbl.reshape(b_pad, 1)
    lblT = lbl.reshape(1, b_pad)

    # Upper-triangular block schedule (cos is symmetric): ~2x fewer MXU flops
    # and tile fetches than the full nt x nt grid.
    pairs = [(bi, bj) for bi in range(nt) for bj in range(bi, nt)]
    row_ids = jnp.asarray([p[0] for p in pairs], dtype=jnp.int32)
    col_ids = jnp.asarray([p[1] for p in pairs], dtype=jnp.int32)
    nsteps = len(pairs)

    kernel = functools.partial(_ms_loss_kernel, alpha=float(alpha),
                               beta=float(beta), base=float(base),
                               c_pad=c_pad, mxu_dtype=mxu_dtype)

    grid_spec = pltpu.PrefetchScalarGridSpec(
        num_scalar_prefetch=3,                        # nclass, row_ids, col_ids -> SMEM
        grid=(nsteps,),
        in_specs=[
            pl.BlockSpec((1, c_pad), lambda t, n, r, c: (0, 0)),     # inv_count (resident)
            pl.BlockSpec((tb, D),    lambda t, n, r, c: (r[t], 0)),  # E row tile
            pl.BlockSpec((tb, D),    lambda t, n, r, c: (c[t], 0)),  # E col tile
            pl.BlockSpec((tb, 1),    lambda t, n, r, c: (r[t], 0)),  # labels row tile
            pl.BlockSpec((tb, 1),    lambda t, n, r, c: (c[t], 0)),  # labels col tile
            pl.BlockSpec((1, tb),    lambda t, n, r, c: (0, c[t])),  # labels col (lane)
        ],
        out_specs=pl.BlockSpec((1, 1), lambda t, n, r, c: (0, 0)),
        scratch_shapes=[
            pltpu.VMEM((1, c_pad), jnp.float32),        # diag(P)/2 accumulator
            pltpu.VMEM((c_pad, c_pad), jnp.float32),    # N (upper-block) accumulator
        ],
    )

    out = pl.pallas_call(
        kernel,
        out_shape=jax.ShapeDtypeStruct((1, 1), jnp.float32),
        grid_spec=grid_spec,
        compiler_params=pltpu.CompilerParams(
            dimension_semantics=("arbitrary",),
            vmem_limit_bytes=48 * 1024 * 1024),
    )(nclass, row_ids, col_ids, inv_count, emb, emb, lbl2d, lbl2d, lblT)
    return out[0, 0]


def _reference(embeddings, labels, num_label_vocab, alpha, beta, base):
    """Plain-JAX reference mirroring the PyTorch forward."""
    eps = 1e-12
    E = embeddings.astype(jnp.float32)
    E = E / jnp.maximum(jnp.linalg.norm(E, axis=1, keepdims=True), eps)
    label_set = jnp.arange(num_label_vocab, dtype=labels.dtype)
    T = (labels[:, None] == label_set[None, :]).astype(jnp.float32)
    nclass = jnp.sum((jnp.sum(T, axis=0) > 0).astype(jnp.float32))
    Tn = T / jnp.maximum(jnp.sum(T, axis=0, keepdims=True), 1.0)
    cos = E @ E.T
    P = Tn.T @ jnp.exp(-alpha * (cos - base)) @ Tn
    N = Tn.T @ jnp.exp(beta * (cos - base)) @ Tn
    eye = jnp.eye(num_label_vocab, dtype=jnp.float32)
    return (jnp.sum(jnp.log(1.0 + P * eye / 2.0)) / (alpha * nclass)
            + jnp.sum(jnp.log(1.0 + N * (1.0 - eye))) / (2.0 * beta * nclass))


if __name__ == "__main__":
    alpha, beta, base = 2.0, 40.0, 0.5
    key = jax.random.PRNGKey(0)
    k1, k2, k3, k4 = jax.random.split(key, 4)

    # Case 1: single-tile path (B=8, D=32, 4-class vocab).
    B1, D1, C1 = 8, 32, 4
    emb1 = jax.random.normal(k1, (B1, D1), dtype=jnp.float32)
    lbl1 = jax.random.randint(k2, (B1,), 0, C1, dtype=jnp.int32)
    loss1 = jax.block_until_ready(
        classwise_multisimilarity_loss(emb1, lbl1, C1, alpha, beta, base))
    ref1 = jax.block_until_ready(_reference(emb1, lbl1, C1, alpha, beta, base))
    assert jnp.allclose(loss1, ref1, rtol=1e-4, atol=1e-4), (loss1, ref1)

    # Case 2: triangular multi-tile grid + batch padding
    # (B=300 -> 128-row tiles, 3x3 blocks -> 6 upper-triangular steps).
    B2, D2, C2 = 300, 64, 7
    emb2 = jax.random.normal(k3, (B2, D2), dtype=jnp.float32)
    lbl2 = jax.random.randint(k4, (B2,), 0, C2, dtype=jnp.int32)
    loss2 = jax.block_until_ready(
        classwise_multisimilarity_loss(emb2, lbl2, C2, alpha, beta, base,
                                       max_tile=128))
    ref2 = jax.block_until_ready(_reference(emb2, lbl2, C2, alpha, beta, base))
    assert jnp.allclose(loss2, ref2, rtol=2e-4, atol=2e-4), (loss2, ref2)

    print("KERNEL_OK")
</pallas_src>

<mosaic_0001>
module attributes {stable_mosaic.version = 11 : i64} {
  func.func @_ms_loss_kernel(%arg0: i32, %arg1: memref<1xi32, #tpu.memory_space<smem>>, %arg2: memref<1xi32, #tpu.memory_space<smem>>, %arg3: memref<1xi32, #tpu.memory_space<smem>>, %arg4: memref<1x128xf32, #tpu.memory_space<vmem>>, %arg5: memref<8x32xf32, #tpu.memory_space<vmem>>, %arg6: memref<8x32xf32, #tpu.memory_space<vmem>>, %arg7: memref<8x1xi32, #tpu.memory_space<vmem>>, %arg8: memref<8x1xi32, #tpu.memory_space<vmem>>, %arg9: memref<1x8xi32, #tpu.memory_space<vmem>>, %arg10: memref<1x1xf32, #tpu.memory_space<vmem>>, %arg11: memref<1x128xf32, #tpu.memory_space<vmem>>, %arg12: memref<128x128xf32, #tpu.memory_space<vmem>>) attributes {dimension_semantics = [#tpu.dimension_semantics<arbitrary>], iteration_bounds = array<i64: 1>, scalar_prefetch = 3 : i64, scratch_operands = 2 : i64, tpu.core_type = #tpu.core_type<tc>, window_params = [{pipeline_mode = #tpu.pipeline_mode<synchronous>, transform_indices = @transform_0, window_bounds = array<i64: 1, 128>}, {transform_indices = @transform_1, window_bounds = array<i64: 8, 32>}, {transform_indices = @transform_2, window_bounds = array<i64: 8, 32>}, {transform_indices = @transform_3, window_bounds = array<i64: 8, 1>}, {transform_indices = @transform_4, window_bounds = array<i64: 8, 1>}, {transform_indices = @transform_5, window_bounds = array<i64: 1, 8>}, {pipeline_mode = #tpu.pipeline_mode<synchronous>, transform_indices = @transform_6, window_bounds = array<i64: 1, 1>}]} {
    %0 = arith.index_cast %arg0 : i32 to index
    %1 = memref.load %arg2[%0] : memref<1xi32, #tpu.memory_space<smem>>
    %2 = arith.index_cast %arg0 : i32 to index
    %3 = memref.load %arg3[%2] : memref<1xi32, #tpu.memory_space<smem>>
    %c0_i32 = arith.constant 0 : i32
    %4 = arith.cmpi eq, %arg0, %c0_i32 : i32
    %5 = arith.extui %4 : i1 to i32
    %c0_i32_0 = arith.constant 0 : i32
    %6 = arith.cmpi ne, %5, %c0_i32_0 : i32
    scf.if %6 {
      %cst_38 = arith.constant 0.000000e+00 : f32
      %74 = vector.broadcast %cst_38 : f32 to vector<1x128xf32>
      %c0_39 = arith.constant 0 : index
      %c0_40 = arith.constant 0 : index
      %75 = vector.load %arg11[%c0_39, %c0_40] : memref<1x128xf32, #tpu.memory_space<vmem>>, vector<1x128xf32>
      tpu.vector_store %arg11[%c0_39, %c0_40], %74 {strides = array<i32>} : memref<1x128xf32, #tpu.memory_space<vmem>>, vector<1x128xf32>,
      %cst_41 = arith.constant 0.000000e+00 : f32
      %76 = vector.broadcast %cst_41 : f32 to vector<128x128xf32>
      %c0_42 = arith.constant 0 : index
      %c0_43 = arith.constant 0 : index
      %77 = vector.load %arg12[%c0_42, %c0_43] : memref<128x128xf32, #tpu.memory_space<vmem>>, vector<128x128xf32>
      tpu.vector_store %arg12[%c0_42, %c0_43], %76 {strides = array<i32>} : memref<128x128xf32, #tpu.memory_space<vmem>>, vector<128x128xf32>,
    } else {
    }
    %c0 = arith.constant 0 : index
    %c0_1 = arith.constant 0 : index
    %7 = vector.load %arg5[%c0, %c0_1] : memref<8x32xf32, #tpu.memory_space<vmem>>, vector<8x32xf32>
    %8 = arith.mulf %7, %7 : vector<8x32xf32>
    %cst = arith.constant dense<0.000000e+00> : vector<8xf32>
    %9 = vector.multi_reduction <add>, %8, %cst [1] : vector<8x32xf32> to vector<8xf32>
    %10 = vector.shape_cast %9 : vector<8xf32> to vector<8x1xf32>
    %cst_2 = arith.constant 1.000000e-24 : f32
    %11 = vector.broadcast %cst_2 : f32 to vector<8x1xf32>
    %12 = arith.maximumf %10, %11 : vector<8x1xf32>
    %13 = math.rsqrt %12 : vector<8x1xf32>
    %14 = vector.broadcast %13 : vector<8x1xf32> to vector<8x32xf32>
    %15 = arith.mulf %7, %14 : vector<8x32xf32>
    %c0_3 = arith.constant 0 : index
    %c0_4 = arith.constant 0 : index
    %16 = vector.load %arg6[%c0_3, %c0_4] : memref<8x32xf32, #tpu.memory_space<vmem>>, vector<8x32xf32>
    %17 = arith.mulf %16, %16 : vector<8x32xf32>
    %cst_5 = arith.constant dense<0.000000e+00> : vector<8xf32>
    %18 = vector.multi_reduction <add>, %17, %cst_5 [1] : vector<8x32xf32> to vector<8xf32>
    %19 = vector.shape_cast %18 : vector<8xf32> to vector<8x1xf32>
    %cst_6 = arith.constant 1.000000e-24 : f32
    %20 = vector.broadcast %cst_6 : f32 to vector<8x1xf32>
    %21 = arith.maximumf %19, %20 : vector<8x1xf32>
    %22 = math.rsqrt %21 : vector<8x1xf32>
    %23 = vector.broadcast %22 : vector<8x1xf32> to vector<8x32xf32>
    %24 = arith.mulf %16, %23 : vector<8x32xf32>
    %cst_7 = arith.constant dense<0.000000e+00> : vector<8x8xf32>
    %25 = tpu.matmul %15, %24, %cst_7 {dimension_numbers = #tpu.dot_dimension_numbers<[1], [1], [0], [0], [0, 0, 1, 0], [], []>} : vector<8x32xf32>, vector<8x32xf32>, vector<8x8xf32> -> vector<8x8xf32>
    %c0_8 = arith.constant 0 : index
    %c0_9 = arith.constant 0 : index
    %26 = vector.load %arg7[%c0_8, %c0_9] : memref<8x1xi32, #tpu.memory_space<vmem>>, vector<8x1xi32>
    %c0_10 = arith.constant 0 : index
    %c0_11 = arith.constant 0 : index
    %27 = vector.load %arg9[%c0_10, %c0_11] : memref<1x8xi32, #tpu.memory_space<vmem>>, vector<1x8xi32>
    %28 = vector.broadcast %26 : vector<8x1xi32> to vector<8x8xi32>
    %29 = vector.broadcast %27 : vector<1x8xi32> to vector<8x8xi32>
    %30 = arith.cmpi eq, %28, %29 : vector<8x8xi32>
    %cst_12 = arith.constant -2.000000e+00 : f32
    %cst_13 = arith.constant 4.000000e+01 : f32
    %31 = vector.broadcast %cst_12 : f32 to vector<8x8xf32>
    %32 = vector.broadcast %cst_13 : f32 to vector<8x8xf32>
    %33 = arith.select %30, %31, %32 : vector<8x8xi1>, vector<8x8xf32>
    %cst_14 = arith.constant 5.000000e-01 : f32
    %34 = vector.broadcast %cst_14 : f32 to vector<8x8xf32>
    %35 = arith.subf %25, %34 : vector<8x8xf32>
    %36 = arith.mulf %33, %35 : vector<8x8xf32>
    %37 = math.exp %36 : vector<8x8xf32>
    %c0_15 = arith.constant 0 : index
    %c0_16 = arith.constant 0 : index
    %38 = vector.load %arg4[%c0_15, %c0_16] : memref<1x128xf32, #tpu.memory_space<vmem>>, vector<1x128xf32>
    %39 = tpu.iota {dimensions = array<i32: 1>} : vector<1x128xi32>
    %c0_17 = arith.constant 0 : index
    %c0_18 = arith.constant 0 : index
    %40 = vector.load %arg7[%c0_17, %c0_18] : memref<8x1xi32, #tpu.memory_space<vmem>>, vector<8x1xi32>
    %41 = vector.broadcast %40 : vector<8x1xi32> to vector<8x128xi32>
    %42 = vector.broadcast %39 : vector<1x128xi32> to vector<8x128xi32>
    %43 = arith.cmpi eq, %41, %42 : vector<8x128xi32>
    %cst_19 = arith.constant 0.000000e+00 : f32
    %44 = vector.shape_cast %38 : vector<1x128xf32> to vector<1x128xf32>
    %45 = vector.broadcast %44 : vector<1x128xf32> to vector<8x128xf32>
    %46 = vector.broadcast %cst_19 : f32 to vector<8x128xf32>
    %47 = arith.select %43, %45, %46 : vector<8x128xi1>, vector<8x128xf32>
    %c0_20 = arith.constant 0 : index
    %c0_21 = arith.constant 0 : index
    %48 = vector.load %arg8[%c0_20, %c0_21] : memref<8x1xi32, #tpu.memory_space<vmem>>, vector<8x1xi32>
    %49 = vector.broadcast %48 : vector<8x1xi32> to vector<8x128xi32>
    %50 = vector.broadcast %39 : vector<1x128xi32> to vector<8x128xi32>
    %51 = arith.cmpi eq, %49, %50 : vector<8x128xi32>
    %cst_22 = arith.constant 0.000000e+00 : f32
    %52 = vector.shape_cast %38 : vector<1x128xf32> to vector<1x128xf32>
    %53 = vector.broadcast %52 : vector<1x128xf32> to vector<8x128xf32>
    %54 = vector.broadcast %cst_22 : f32 to vector<8x128xf32>
    %55 = arith.select %51, %53, %54 : vector<8x128xi1>, vector<8x128xf32>
    %56 = arith.cmpi eq, %1, %3 : i32
    %cst_23 = arith.constant 5.000000e-01 : f32
    %cst_24 = arith.constant 1.000000e+00 : f32
    %57 = arith.select %56, %cst_23, %cst_24 : f32
    %58 = vector.broadcast %57 : f32 to vector<8x128xf32>
    %59 = arith.mulf %47, %58 : vector<8x128xf32>
    %cst_25 = arith.constant dense<0.000000e+00> : vector<8x128xf32>
    %60 = tpu.matmul %37, %55, %cst_25 {dimension_numbers = #tpu.dot_dimension_numbers<[1], [0], [0], [1], [0, 0, 1, 1], [], []>} : vector<8x8xf32>, vector<8x128xf32>, vector<8x128xf32> -> vector<8x128xf32>
    %c0_26 = arith.constant 0 : index
    %c0_27 = arith.constant 0 : index
    %61 = vector.load %arg11[%c0_26, %c0_27] : memref<1x128xf32, #tpu.memory_space<vmem>>, vector<1x128xf32>
    %62 = arith.mulf %59, %60 : vector<8x128xf32>
    %cst_28 = arith.constant dense<0.000000e+00> : vector<128xf32>
    %63 = vector.multi_reduction <add>, %62, %cst_28 [0] : vector<8x128xf32> to vector<128xf32>
    %64 = vector.shape_cast %63 : vector<128xf32> to vector<1x128xf32>
    %65 = arith.addf %61, %64 : vector<1x128xf32>
    %c0_29 = arith.constant 0 : index
    %c0_30 = arith.constant 0 : index
    %66 = vector.load %arg11[%c0_29, %c0_30] : memref<1x128xf32, #tpu.memory_space<vmem>>, vector<1x128xf32>
    tpu.vector_store %arg11[%c0_29, %c0_30], %65 {strides = array<i32>} : memref<1x128xf32, #tpu.memory_space<vmem>>, vector<1x128xf32>,
    %c0_31 = arith.constant 0 : index
    %c0_32 = arith.constant 0 : index
    %67 = vector.load %arg12[%c0_31, %c0_32] : memref<128x128xf32, #tpu.memory_space<vmem>>, vector<128x128xf32>
    %cst_33 = arith.constant dense<0.000000e+00> : vector<128x128xf32>
    %68 = tpu.matmul %59, %60, %cst_33 {dimension_numbers = #tpu.dot_dimension_numbers<[0], [0], [1], [1], [0, 1, 1, 1], [], []>} : vector<8x128xf32>, vector<8x128xf32>, vector<128x128xf32> -> vector<128x128xf32>
    %69 = arith.addf %67, %68 : vector<128x128xf32>
    %c0_34 = arith.constant 0 : index
    %c0_35 = arith.constant 0 : index
    %70 = vector.load %arg12[%c0_34, %c0_35] : memref<128x128xf32, #tpu.memory_space<vmem>>, vector<128x128xf32>
    tpu.vector_store %arg12[%c0_34, %c0_35], %69 {strides = array<i32>} : memref<128x128xf32, #tpu.memory_space<vmem>>, vector<128x128xf32>,
    %c0_i32_36 = arith.constant 0 : i32
    %71 = arith.cmpi eq, %arg0, %c0_i32_36 : i32
    %72 = arith.extui %71 : i1 to i32
    %c0_i32_37 = arith.constant 0 : i32
    %73 = arith.cmpi ne, %72, %c0_i32_37 : i32
    scf.if %73 {
      %c0_38 = arith.constant 0 : index
      %74 = memref.load %arg1[%c0_38] : memref<1xi32, #tpu.memory_space<smem>>
      %75 = arith.sitofp %74 : i32 to f32
      %c0_39 = arith.constant 0 : index
      %c0_40 = arith.constant 0 : index
      %76 = vector.load %arg11[%c0_39, %c0_40] : memref<1x128xf32, #tpu.memory_space<vmem>>, vector<1x128xf32>
      %cst_41 = arith.constant 1.000000e+00 : f32
      %77 = vector.broadcast %cst_41 : f32 to vector<1x128xf32>
      %78 = arith.addf %77, %76 : vector<1x128xf32>
      %79 = math.log %78 : vector<1x128xf32>
      %80 = vector.shape_cast %79 : vector<1x128xf32> to vector<1x1x128xf32>
      %cst_42 = arith.constant dense<0.000000e+00> : vector<1xf32>
      %81 = vector.multi_reduction <add>, %80, %cst_42 [1, 2] : vector<1x1x128xf32> to vector<1xf32>
      %82 = vector.shape_cast %81 : vector<1xf32> to vector<1x1x1xf32>
      %83 = vector.extract %82[0, 0, 0] : f32 from vector<1x1x1xf32>
      %84 = vector.broadcast %83 : f32 to vector<1x1xf32>
      %c0_43 = arith.constant 0 : index
      %c0_44 = arith.constant 0 : index
      %85 = vector.load %arg12[%c0_43, %c0_44] : memref<128x128xf32, #tpu.memory_space<vmem>>, vector<128x128xf32>
      %c0_45 = arith.constant 0 : index
      %c0_46 = arith.constant 0 : index
      %86 = vector.load %arg12[%c0_45, %c0_46] : memref<128x128xf32, #tpu.memory_space<vmem>>, vector<128x128xf32>
      %87 = tpu.transpose %86, [1, 0] : vector<128x128xf32> -> vector<128x128xf32>
      %88 = arith.addf %85, %87 : vector<128x128xf32>
      %89 = tpu.iota {dimensions = array<i32: 0>} : vector<128x128xi32>
      %90 = tpu.iota {dimensions = array<i32: 1>} : vector<128x128xi32>
      %91 = arith.cmpi ne, %89, %90 : vector<128x128xi32>
      %92 = arith.extui %91 : vector<128x128xi1> to vector<128x128xi32>
      %93 = arith.sitofp %92 : vector<128x128xi32> to vector<128x128xf32>
      %94 = arith.mulf %88, %93 : vector<128x128xf32>
      %cst_47 = arith.constant 1.000000e+00 : f32
      %95 = vector.broadcast %cst_47 : f32 to vector<128x128xf32>
      %96 = arith.addf %95, %94 : vector<128x128xf32>
      %97 = math.log %96 : vector<128x128xf32>
      %98 = vector.shape_cast %97 : vector<128x128xf32> to vector<1x128x128xf32>
      %cst_48 = arith.constant dense<0.000000e+00> : vector<1xf32>
      %99 = vector.multi_reduction <add>, %98, %cst_48 [1, 2] : vector<1x128x128xf32> to vector<1xf32>
      %100 = vector.shape_cast %99 : vector<1xf32> to vector<1x1x1xf32>
      %101 = vector.extract %100[0, 0, 0] : f32 from vector<1x1x1xf32>
      %102 = vector.broadcast %101 : f32 to vector<1x1xf32>
      %cst_49 = arith.constant 2.000000e+00 : f32
      %103 = arith.mulf %cst_49, %75 : f32
      %104 = vector.broadcast %103 : f32 to vector<1x1xf32>
      %105 = arith.divf %84, %104 : vector<1x1xf32>
      %cst_50 = arith.constant 8.000000e+01 : f32
      %106 = arith.mulf %cst_50, %75 : f32
      %107 = vector.broadcast %106 : f32 to vector<1x1xf32>
      %108 = arith.divf %102, %107 : vector<1x1xf32>
      %109 = arith.addf %105, %108 : vector<1x1xf32>
      %c0_51 = arith.constant 0 : index
      %c0_52 = arith.constant 0 : index
      %110 = vector.load %arg10[%c0_51, %c0_52] : memref<1x1xf32, #tpu.memory_space<vmem>>, vector<1x1xf32>
      tpu.vector_store %arg10[%c0_51, %c0_52], %109 {strides = array<i32>} : memref<1x1xf32, #tpu.memory_space<vmem>>, vector<1x1xf32>,
    } else {
    }
    return
  }
  func.func @transform_0(%arg0: i32, %arg1: memref<1xi32, #tpu.memory_space<smem>>, %arg2: memref<1xi32, #tpu.memory_space<smem>>, %arg3: memref<1xi32, #tpu.memory_space<smem>>) -> (i32, i32) {
    %c0_i32 = arith.constant 0 : i32
    %c0_i32_0 = arith.constant 0 : i32
    %c0_i32_1 = arith.constant 0 : i32
    return %c0_i32, %c0_i32_0 : i32, i32
  }
  func.func @transform_1(%arg0: i32, %arg1: memref<1xi32, #tpu.memory_space<smem>>, %arg2: memref<1xi32, #tpu.memory_space<smem>>, %arg3: memref<1xi32, #tpu.memory_space<smem>>) -> (i32, i32) {
    %0 = arith.index_cast %arg0 : i32 to index
    %1 = memref.load %arg2[%0] : memref<1xi32, #tpu.memory_space<smem>>
    %c0_i32 = arith.constant 0 : i32
    %c0_i32_0 = arith.constant 0 : i32
    return %1, %c0_i32 : i32, i32
  }
  func.func @transform_2(%arg0: i32, %arg1: memref<1xi32, #tpu.memory_space<smem>>, %arg2: memref<1xi32, #tpu.memory_space<smem>>, %arg3: memref<1xi32, #tpu.memory_space<smem>>) -> (i32, i32) {
    %0 = arith.index_cast %arg0 : i32 to index
    %1 = memref.load %arg3[%0] : memref<1xi32, #tpu.memory_space<smem>>
    %c0_i32 = arith.constant 0 : i32
    %c0_i32_0 = arith.constant 0 : i32
    return %1, %c0_i32 : i32, i32
  }
  func.func @transform_3(%arg0: i32, %arg1: memref<1xi32, #tpu.memory_space<smem>>, %arg2: memref<1xi32, #tpu.memory_space<smem>>, %arg3: memref<1xi32, #tpu.memory_space<smem>>) -> (i32, i32) {
    %0 = arith.index_cast %arg0 : i32 to index
    %1 = memref.load %arg2[%0] : memref<1xi32, #tpu.memory_space<smem>>
    %c0_i32 = arith.constant 0 : i32
    %c0_i32_0 = arith.constant 0 : i32
    return %1, %c0_i32 : i32, i32
  }
  func.func @transform_4(%arg0: i32, %arg1: memref<1xi32, #tpu.memory_space<smem>>, %arg2: memref<1xi32, #tpu.memory_space<smem>>, %arg3: memref<1xi32, #tpu.memory_space<smem>>) -> (i32, i32) {
    %0 = arith.index_cast %arg0 : i32 to index
    %1 = memref.load %arg3[%0] : memref<1xi32, #tpu.memory_space<smem>>
    %c0_i32 = arith.constant 0 : i32
    %c0_i32_0 = arith.constant 0 : i32
    return %1, %c0_i32 : i32, i32
  }
  func.func @transform_5(%arg0: i32, %arg1: memref<1xi32, #tpu.memory_space<smem>>, %arg2: memref<1xi32, #tpu.memory_space<smem>>, %arg3: memref<1xi32, #tpu.memory_space<smem>>) -> (i32, i32) {
    %0 = arith.index_cast %arg0 : i32 to index
    %1 = memref.load %arg3[%0] : memref<1xi32, #tpu.memory_space<smem>>
    %c0_i32 = arith.constant 0 : i32
    %c0_i32_0 = arith.constant 0 : i32
    return %c0_i32, %1 : i32, i32
  }
  func.func @transform_6(%arg0: i32, %arg1: memref<1xi32, #tpu.memory_space<smem>>, %arg2: memref<1xi32, #tpu.memory_space<smem>>, %arg3: memref<1xi32, #tpu.memory_space<smem>>) -> (i32, i32) {
    %c0_i32 = arith.constant 0 : i32
    %c0_i32_0 = arith.constant 0 : i32
    %c0_i32_1 = arith.constant 0 : i32
    return %c0_i32, %c0_i32_0 : i32, i32
  }
}

</mosaic_0001>

<bundles_post_ra>
// kernel: tpu_custom_call.1
= control target key start
LH: loop header
LB: loop body
LE: loop exit
PB: predicated region body
PF: predicated region fallthrough
CT: control target
= control target key end

     0   :  { %s1332_s0 = inlined_call_operand.<no memory space> [shape: s32[1], index: 0, kind: input, shape index: {}]   ;;  %s1333_s1 = inlined_call_operand.<no memory space> [shape: s32[1], index: 1, kind: input, shape index: {}]   ;;  %s1334_s2 = inlined_call_operand.<no memory space> [shape: s32[1], index: 2, kind: input, shape index: {}]   ;;  %s1335_s3 = inlined_call_operand.vmem [shape: f32[1,128], index: 3, kind: input, shape index: {}]   ;;  %s1336_s4 = inlined_call_operand.vmem [shape: f32[8,32], index: 4, kind: input, shape index: {}]   ;;  %s1337_s5 = inlined_call_operand.vmem [shape: f32[8,32], index: 5, kind: input, shape index: {}]   ;;  %s1338_s6 = inlined_call_operand.vmem [shape: s32[8,1], index: 6, kind: input, shape index: {}]   ;;  %s1339_s7 = inlined_call_operand.vmem [shape: s32[8,1], index: 7, kind: input, shape index: {}]   ;;  %s1340_s8 = inlined_call_operand.vmem [shape: s32[1,8], index: 8, kind: input, shape index: {}]   ;;  %s1341_s9 = inlined_call_operand.hbm [shape: f32[1,1], index: 9, kind: output, shape index: {}]  }
   0x1   :  { %p90_p0 = scmp.lt.s32.totalorder %s1334_s2, 0  ;;  %p84_p1 = scmp.lt.s32.totalorder %s1333_s1, 0 }
   0x2   :  { %17 = vsyncpa [#allocation9], 0  ;;  %vm137_vm0 = vcmask 261120   ;;  %v1093_v6 = vmov 0.0   ;;  %vm1094_vm1 = vmmov 0   ;;  %v1095_v7 = vmov 0   ;;  %p260_p2 = scmp.eq.s32.totalorder %s1333_s1, %s1334_s2 }
   0x3   :  { %s1157_s15 = scalar_select %p90_p0, %s1334_s2, 0  ;;  %976 = vmatprep.subr.mxu0 %v1093_v6  ;;  %118 = vst [vmem:[#allocation2] sm:$0x1] %v1093_v6  ;;  %978 = vmatprep.mubr.msk.f32.mxu0 %vm1094_vm1, %v1093_v6  ;;  %v244_v20 = vlaneseq  ;;  %v920_v23 = vld [vmem:[%s1335_s3] ss:$0 sm:$0xff]  ;;  %v1096_v27 = vmov 40.0  }
   0x4   :  { %s85_s18 = scalar_select %p84_p1, %s1333_s1, 0  ;;  %1023 = vset.pattern.permute.xlu1 %v1095_v7  ;;  %vm264_vm5 = vcmask 64512   ;;  %vm630_vm6 = vcmask 1040384  }
   0x5   :  { %s913_s19 = sshll.u32 %s1157_s15, 3  ;;  %v1191_v21 = vand.u32 127, %v244_v20  ;;  %s625_s3 = scvt.s32.f32 %s1332_s0 }
   0x6   :  { %s93_s22 = scalar_lea.vmem %s1337_s5, %s913_s19  ;;  %s912_s23 = sshll.u32 %s85_s18, 3 }
   0x7   :  { %v144_v0 = vld [vmem:[%s93_s22] sm:$0xff]  ;;  %s87_s26 = scalar_lea.vmem %s1336_s4, %s912_s23  ;;  %s99_s27 = scalar_lea.vmem %s1338_s6, %s912_s23 }
   0x8   :  { %v145_v1 = vmul.f32 %v144_v0, %v144_v0  ;;  %v135_v2 = vld [vmem:[%s87_s26] sm:$0xff]  ;;  %s105_s30 = scalar_lea.vmem %s1339_s7, %s913_s19  ;;  %s110_s7 = scalar_lea.vmem %s1340_s8, %s1157_s15 }
   0x9   :  { %v136_v3 = vmul.f32 %v135_v2, %v135_v2  ;;  %v228_v8 = vld [vmem:[%s99_s27] sm:$0xff]  ;;  %s261_s14 = scalar_select %p260_p2, 0.5, 1.0 }
   0xa   :  { %v146_v4 = vsel %vm137_vm0, %v145_v1, 0.0  ;;  %231 = vperm.xlu1 %1023, %v228_v8   ;;  %v254_v9 = vld [vmem:[%s105_s30] sm:$0xff]  ;;  %s860_s17 = smul.f32 2.0, %s625_s3  ;;  %s1097_s21 = smov [#allocation8]  }
   0xb   :  { %147 = vadd.xlane.f32.xlu0 %v146_v4  ;;  %v138_v5 = vsel %vm137_vm0, %v136_v3, 0.0  ;;  %v918_v18 = vld [vmem:[%s110_s7] ss:$0 sm:$0xff]  ;;  %v262_v25 = vstv %s261_s14  ;;  %s864_s18 = smul.f32 80.0, %s625_s3  ;;  %s877_s22 = sshll.u32 %s1097_s21, 4  ;;  %s878_s22 = int_to_ptr.vmem [resolvable:$true] %s877_s22 }
   0xc   :  { %v338_v58 = vld [vmem:[#allocation2] sm:$0x1]  ;;  %s1069_s0 = scalar_lea.vmem %s878_s22, 16  ;;  %s1073_s23 = scalar_lea.vmem %s878_s22, 32 }
   0xd   :  { %p1070_p3 = scmp.ne.s32.totalorder %s878_s22, %s1069_s0  ;;  %p1074_p4 = scmp.lt.s32.totalorder %s878_s22, %s878_s22 }
   0xe   :  { %256 = vperm.xlu1 %1023, %v254_v9   ;;  %p1075_p5 = scmp.lt.s32.totalorder %s1073_s23, %s1069_s0 }
   0xf   :  { %139 = vadd.xlane.f32.xlu0 %v138_v5 }
  0x10   :  { %p1076_p6 = por %p1075_p5, %p1074_p4 }
  0x12   :  { %p1077_p7 = pnand %p1076_p6, %p1070_p3 }
  0x89   :  { %v232_v19 = vpop.permute.xlu1 %231 }
  0x8a   :  { %vm237_vm2 = vcmp.eq.s32.totalorder %v232_v19, %v918_v18  ;;  %vm246_vm3 = vcmp.eq.s32.totalorder %v232_v19, %v1191_v21 }
  0x8b   :  { %v253_v24 = vsel %vm246_vm3, %v920_v23, 0.0  ;;  %v238_v28 = vsel %vm237_vm2, -2.0, %v1096_v27 }
  0x8c   :  { %v263_v26 = vmul.f32 %v262_v25, %v253_v24 }
  0x8d   :  { %v257_v22 = vpop.permute.xlu1 %256 }
  0x8e   :  { %vm258_vm4 = vcmp.eq.s32.totalorder %v257_v22, %v1191_v21  ;;  %364 = vxpose.xlu0.b32.start.end [1/1] (short) %v263_v26, 128 }
  0x98   :  { %v148_v10 = vpop.xlane.xlu0 %147 }
  0x99   :  { %v149_v11 = vmax.f32 %v148_v10, 1e-24 }
  0x9b   :  { %1025 = vrsqrt.f32 %v149_v11 }
  0x9c   :  { %v140_v12 = vpop.xlane.xlu0 %139 }
  0x9d   :  { %v141_v13 = vmax.f32 %v140_v12, 1e-24 }
  0x9f   :  { %1027 = vrsqrt.f32 %v141_v13 }
  0xa5   :  { %v1026_v14 = vpop.eup %1025 }
  0xa6   :  { %v151_v15 = vmul.f32 %v1026_v14, %v144_v0 }
  0xa8   :  { %977 = vmatpush3.xpose.msk.msra.mxu0 %vm137_vm0, %v151_v15 }
  0xa9   :  { %v1028_v16 = vpop.eup %1027  ;;  %981 = vmatprep.subr.mxu0 %v1093_v6 }
  0xaa   :  { %v143_v17 = vmul.f32 %v1028_v16, %v135_v2 }
  0xac   :  { %979 = vmatmul.mubr.msk.f32.vlgmr.msra.gmra.mrb[0].mxu0 %vm137_vm0, %v143_v17 }
  0xad   :  { %983 = vmatprep.mubr.msk.f32.mxu0 %vm1094_vm1, %v1093_v6  ;;  %982 = vmatpush3.msk.msra.mxu0 %vm258_vm4, %v920_v23 }
  0xb7   :  { %1024 = vset.pattern.permute.xlu0 %v1095_v7 }
 0x10e   :  { %v380_v34 = vpop.trf.xlu0 }
 0x112   :  { %v381_v36 = vpop.trf.xlu0 }
 0x116   :  { %v382_v37 = vpop.trf.xlu0 }
 0x11a   :  { %v383_v38 = vpop.trf.xlu0 }
 0x11e   :  { %v384_v39 = vpop.trf.xlu0 }
 0x122   :  { %v385_v40 = vpop.trf.xlu0 }
 0x126   :  { %v386_v41 = vpop.trf.xlu0 }
 0x127   :  { %997 = vmatprep.mubr.msk.f32.mxu1 %vm264_vm5, %v386_v41 }
 0x12a   :  { %v387_v42 = vpop.trf.xlu0 }
 0x12e   :  { %v388_v43 = vpop.trf.xlu0 }
 0x132   :  { %v389_v44 = vpop.trf.xlu0 }
 0x136   :  { %v390_v45 = vpop.trf.xlu0 }
 0x13a   :  { %v391_v46 = vpop.trf.xlu0 }
 0x13e   :  { %v392_v47 = vpop.trf.xlu0 }
 0x142   :  { %v393_v52 = vpop.trf.xlu0 }
 0x146   :  { %v394_v56 = vpop.trf.xlu0 }
 0x14a   :  { %v395_v61 = vpop.trf.xlu0 }
 0x17f   :  { %v224_v29 = vpop.f32.mrb[0].mxu0 }
 0x180   :  { %v919_v30 = vadd.f32 -0.5, %v224_v29  ;;  %v980_v31 = vpop.f32.mrb[1].mxu0  ;;  %v1256_v29 = vshrl.u32 %v244_v20, 7 }
 0x182   :  { %v240_v32 = vmul.f32 %v919_v30, %v238_v28  ;;  %vm723_vm7 = vcmp.ne.s32.totalorder %v1256_v29, %v1191_v21  ;;  %v708_v30 = vadd.s32 8, %v1256_v29  ;;  %v710_v20 = vadd.s32 24, %v1256_v29 }
 0x183   :  { %v939_v31 = vsel %vm723_vm7, 1.0, %v1093_v6  ;;  %vm869_vm7 = vcmask 0  }
 0x184   :  { %v241_v33 = vmul.f32 1.442695, %v240_v32  ;;  %vm724_vm8 = vcmp.ne.s32.totalorder %v708_v30, %v1191_v21  ;;  %vm726_vm10 = vcmp.ne.s32.totalorder %v710_v20, %v1191_v21 }
 0x186   :  { %1029 = vpow2.f32 %v241_v33 }
 0x190   :  { %v1030_v35 = vpop.eup %1029 }
 0x191   :  { %984 = vmatmul.mubr.msk.f32.vlgmr.msra.gmra.mrb[2].mxu0 %vm264_vm5, %v1030_v35 }
 0x192   :  { %988 = vmatprep.mubr.msk.f32.mxu0 %vm264_vm5, %v380_v34  ;;  %v709_v34 = vadd.s32 16, %v1256_v29 }
 0x194   :  { %vm725_vm9 = vcmp.ne.s32.totalorder %v709_v34, %v1191_v21  ;;  %v716_v34 = vadd.s32 72, %v1256_v29 }
 0x195   :  { %v941_v41 = vsel %vm725_vm9, 1.0, %v1093_v6 }
 0x196   :  { %vm732_vm0 = vcmp.ne.s32.totalorder %v716_v34, %v1191_v21 }
 0x264   :  { %v334_v48 = vpop.f32.mrb[2].mxu0 }
 0x265   :  { %v339_v49 = vmul.f32 %v334_v48, %v263_v26  ;;  %v985_v50 = vpop.f32.mrb[3].mxu0  ;;  %986 = vmatprep.subr.mxu0 %v334_v48  ;;  %1012 = vmatprep.subr.mxu1 %v334_v48 }
 0x266   :  { %987 = vmatpush3.msra.mxu0 %v334_v48  ;;  %1013 = vmatpush3.msra.mxu1 %v334_v48 }
 0x267   :  { %v340_v51 = vrot.slane %v339_v49, 4  ;;  %989 = vmatmul.mubr.msk.f32.vlgmr.msra.gmra.mrb[4].mxu0 %vm264_vm5, %v381_v36  ;;  %998 = vmatmul.mubr.msk.f32.vlgmr.msra.gmra.mrb[0].mxu1 %vm264_vm5, %v387_v42  ;;  %v940_v36 = vsel %vm724_vm8, 1.0, %v1093_v6 }
 0x268   :  { %991 = vmatprep.mubr.msk.f32.mxu0 %vm264_vm5, %v382_v37  ;;  %1000 = vmatprep.mubr.msk.f32.mxu1 %vm264_vm5, %v388_v43 }
 0x269   :  { %v341_v53 = vadd.f32 %v340_v51, %v339_v49  ;;  %v712_v51 = vadd.s32 40, %v1256_v29 }
 0x26b   :  { %v342_v54 = vrot.slane %v341_v53, 2  ;;  %992 = vmatmul.mubr.msk.f32.gmra.mrb[6].mxu0 %vm264_vm5, %v383_v38  ;;  %1001 = vmatmul.mubr.msk.f32.gmra.mrb[2].mxu1 %vm264_vm5, %v389_v44  ;;  %vm728_vm12 = vcmp.ne.s32.totalorder %v712_v51, %v1191_v21 }
 0x26c   :  { %994 = vmatprep.mubr.msk.f32.mxu0 %vm264_vm5, %v384_v39  ;;  %1003 = vmatprep.mubr.msk.f32.mxu1 %vm264_vm5, %v390_v45  ;;  %v711_v45 = vadd.s32 32, %v1256_v29 }
 0x26d   :  { %v343_v55 = vadd.f32 %v342_v54, %v341_v53 }
 0x26e   :  { %vm727_vm11 = vcmp.ne.s32.totalorder %v711_v45, %v1191_v21 }
 0x26f   :  { %v344_v57 = vrot.slane %v343_v55, 1  ;;  %995 = vmatmul.mubr.msk.f32.gmra.mrb[8].mxu0 %vm264_vm5, %v385_v40  ;;  %1004 = vmatmul.mubr.msk.f32.gmra.mrb[4].mxu1 %vm264_vm5, %v391_v46  ;;  %v943_v53 = vsel %vm727_vm11, 1.0, %v1093_v6 }
 0x270   :  { %1006 = vmatprep.mubr.msk.f32.mxu1 %vm264_vm5, %v392_v47  ;;  %v942_v47 = vsel %vm726_vm10, 1.0, %v1093_v6 }
 0x271   :  { %v345_v59 = vadd.f32 %v344_v57, %v343_v55  ;;  %v713_v57 = vadd.s32 48, %v1256_v29 }
 0x273   :  { %v346_v60 = vadd.f32 %v345_v59, %v338_v58  ;;  %1007 = vmatmul.mubr.msk.f32.gmra.mrb[6].mxu1 %vm264_vm5, %v393_v52  ;;  %vm729_vm13 = vcmp.ne.s32.totalorder %v713_v57, %v1191_v21  ;;  %v719_v57 = vadd.s32 96, %v1256_v29 }
 0x274   :  { %1009 = vmatprep.mubr.msk.f32.mxu1 %vm264_vm5, %v394_v56 }
 0x275   :  { %347 = vst [vmem:[#allocation2] sm:$0x1] %v346_v60  ;;  %v944_v60 = vsel %vm728_vm12, 1.0, %v1093_v6  ;;  %vm735_vm3 = vcmp.ne.s32.totalorder %v719_v57, %v1191_v21 }
 0x277   :  { %1010 = vmatmul.mubr.msk.f32.gmra.mrb[8].mxu1 %vm264_vm5, %v395_v61 }
 0x27c   :  { %v626_v62 = vld [vmem:[#allocation2] sm:$0x1] }
 0x27d   :  { %v627_v63 = vadd.f32 1.0, %v626_v62 }
 0x27f   :  { %1031 = vlog2.f32 %v627_v63 }
 0x289   :  { %v1032_v0 = vpop.eup %1031 }
 0x28a   :  { %v629_v1 = vmul.f32 0.6931472, %v1032_v0 }
 0x28c   :  { %v631_v2 = vsel %vm630_vm6, %v629_v1, 0.0  ;;  %v714_v1 = vadd.s32 56, %v1256_v29 }
 0x28d   :  { %632 = vadd.xlane.f32.xlu0 %v631_v2 }
 0x28e   :  { %vm730_vm14 = vcmp.ne.s32.totalorder %v714_v1, %v1191_v21  ;;  %v720_v1 = vadd.s32 104, %v1256_v29 }
 0x290   :  { %vm736_vm4 = vcmp.ne.s32.totalorder %v720_v1, %v1191_v21 }
 0x31a   :  { %v633_v3 = vpop.xlane.xlu0 %632 }
 0x31b   :  { %v634_v4 = vrot.slane %v633_v3, 4 }
 0x31d   :  { %v635_v5 = vadd.f32 %v634_v4, %v633_v3 }
 0x31f   :  { %v636_v7 = vrot.slane %v635_v5, 2 }
 0x321   :  { %v637_v8 = vadd.f32 %v636_v7, %v635_v5  ;;  %v945_v7 = vsel %vm729_vm13, 1.0, %v1093_v6 }
 0x323   :  { %v638_v9 = vrot.slane %v637_v8, 1 }
 0x325   :  { %v639_v10 = vadd.f32 %v638_v9, %v637_v8 }
 0x327   :  { %1014 = vpush %v639_v10 }
 0x33a   :  { %v990_v11 = vpop.f32.mrb[4].mxu0  ;;  %v1222_v12 = vpop.f32.mrb[0].mxu1 }
 0x33b   :  { %v510_v13 = vpop.f32.mrb[5].mxu0  ;;  %v1224_v14 = vpop.f32.mrb[1].mxu1 }
 0x33c   :  { %658 = vxpose.xlu1.b32.start [1/16] %v510_v13, 128 }
 0x33e   :  { %v993_v15 = vpop.f32.mrb[6].mxu0  ;;  %v1226_v16 = vpop.f32.mrb[2].mxu1 }
 0x33f   :  { %v520_v17 = vpop.f32.mrb[7].mxu0  ;;  %v1228_v18 = vpop.f32.mrb[3].mxu1 }
 0x340   :  { %659 = vxpose.xlu1.b32.cont [2/16] %v990_v11, 128 }
 0x342   :  { %v1230_v19 = vpop.f32.mrb[8].mxu0  ;;  %v1232_v22 = vpop.f32.mrb[4].mxu1 }
 0x343   :  { %v530_v23 = vpop.f32.mrb[9].mxu0  ;;  %v1234_v24 = vpop.f32.mrb[5].mxu1 }
 0x344   :  { %660 = vxpose.xlu1.b32.cont [3/16] %v520_v17, 128 }
 0x346   :  { %v1236_v25 = vpop.f32.mrb[6].mxu1 }
 0x347   :  { %v1238_v26 = vpop.f32.mrb[7].mxu1 }
 0x348   :  { %661 = vxpose.xlu1.b32.cont [4/16] %v993_v15, 128 }
 0x34a   :  { %v1240_v27 = vpop.f32.mrb[8].mxu1 }
 0x34b   :  { %v1242_v28 = vpop.f32.mrb[9].mxu1 }
 0x34c   :  { %662 = vxpose.xlu1.b32.cont [5/16] %v530_v23, 128 }
 0x350   :  { %663 = vxpose.xlu1.b32.cont [6/16] %v1230_v19, 128 }
 0x354   :  { %664 = vxpose.xlu1.b32.cont [7/16] %v1224_v14, 128 }
 0x358   :  { %665 = vxpose.xlu1.b32.cont [8/16] %v1222_v12, 128  ;;  %s1015_s19 = spop %1014 }
 0x35c   :  { %666 = vxpose.xlu1.b32.cont [9/16] %v1228_v18, 128 }
 0x360   :  { %667 = vxpose.xlu1.b32.cont [10/16] %v1226_v16, 128 }
 0x364   :  { %668 = vxpose.xlu1.b32.cont [11/16] %v1234_v24, 128 }
 0x368   :  { %669 = vxpose.xlu1.b32.cont [12/16] %v1232_v22, 128 }
 0x36c   :  { %670 = vxpose.xlu1.b32.cont [13/16] %v1238_v26, 128 }
 0x370   :  { %671 = vxpose.xlu1.b32.cont [14/16] %v1236_v25, 128 }
 0x374   :  { %672 = vxpose.xlu1.b32.cont [15/16] %v1242_v28, 128 }
 0x378   :  { %673 = vxpose.xlu1.b32.end [16/16] %v1240_v27, 128 }
 0x3bc   :  { %v674_v32 = vpop.trf.xlu1 }
 0x3bd   :  { %v690_v33 = vadd.f32 %v674_v32, %v510_v13  ;;  %v715_v13 = vadd.s32 64, %v1256_v29 }
 0x3bf   :  { %v771_v35 = vmul.f32 %v939_v31, %v690_v33  ;;  %vm731_vm15 = vcmp.ne.s32.totalorder %v715_v13, %v1191_v21 }
 0x3c0   :  { %v675_v37 = vpop.trf.xlu1 }
 0x3c1   :  { %v787_v38 = vadd.f32 1.0, %v771_v35  ;;  %v691_v39 = vadd.f32 %v990_v11, %v675_v37  ;;  %v947_v37 = vsel %vm731_vm15, 1.0, %v1093_v6 }
 0x3c3   :  { %v772_v40 = vmul.f32 %v940_v36, %v691_v39  ;;  %1033 = vlog2.f32 %v787_v38 }
 0x3c4   :  { %v676_v42 = vpop.trf.xlu1 }
 0x3c5   :  { %v788_v43 = vadd.f32 1.0, %v772_v40  ;;  %v692_v44 = vadd.f32 %v676_v42, %v520_v17 }
 0x3c7   :  { %1035 = vlog2.f32 %v788_v43  ;;  %v773_v46 = vmul.f32 %v941_v41, %v692_v44  ;;  %v717_v41 = vadd.s32 80, %v1256_v29  ;;  %v948_v44 = vsel %vm732_vm0, 1.0, %v1093_v6 }
 0x3c8   :  { %v677_v48 = vpop.trf.xlu1 }
 0x3c9   :  { %v789_v49 = vadd.f32 1.0, %v773_v46  ;;  %v693_v50 = vadd.f32 %v993_v15, %v677_v48  ;;  %vm733_vm1 = vcmp.ne.s32.totalorder %v717_v41, %v1191_v21 }
 0x3cb   :  { %1037 = vlog2.f32 %v789_v49  ;;  %v774_v52 = vmul.f32 %v942_v47, %v693_v50  ;;  %v718_v49 = vadd.s32 88, %v1256_v29 }
 0x3cc   :  { %v678_v54 = vpop.trf.xlu1 }
 0x3cd   :  { %v790_v55 = vadd.f32 1.0, %v774_v52  ;;  %v694_v56 = vadd.f32 %v678_v54, %v530_v23  ;;  %v1034_v58 = vpop.eup %1033  ;;  %v946_v23 = vsel %vm730_vm14, 1.0, %v1093_v6  ;;  %v949_v52 = vsel %vm733_vm1, 1.0, %v1093_v6 }
 0x3ce   :  { %v804_v2 = vmul.f32 0.6931472, %v1034_v58  ;;  %vm734_vm2 = vcmp.ne.s32.totalorder %v718_v49, %v1191_v21 }
 0x3cf   :  { %1039 = vlog2.f32 %v790_v55  ;;  %v775_v59 = vmul.f32 %v943_v53, %v694_v56 }
 0x3d0   :  { %v679_v61 = vpop.trf.xlu1 }
 0x3d1   :  { %v1036_v62 = vpop.eup %1035  ;;  %v791_v63 = vadd.f32 1.0, %v775_v59  ;;  %v695_v0 = vadd.f32 %v1230_v19, %v679_v61 }
 0x3d2   :  { %v806_v3 = vmul.f32 0.6931472, %v1036_v62 }
 0x3d3   :  { %1041 = vlog2.f32 %v791_v63  ;;  %v776_v4 = vmul.f32 %v944_v60, %v695_v0  ;;  %v950_v60 = vsel %vm734_vm2, 1.0, %v1093_v6 }
 0x3d4   :  { %v835_v5 = vadd.f32 %v806_v3, %v804_v2  ;;  %v680_v8 = vpop.trf.xlu1 }
 0x3d5   :  { %v1038_v9 = vpop.eup %1037  ;;  %v792_v10 = vadd.f32 1.0, %v776_v4  ;;  %v696_v11 = vadd.f32 %v680_v8, %v1224_v14  ;;  %v951_v4 = vsel %vm735_vm3, 1.0, %v1093_v6 }
 0x3d6   :  { %v808_v15 = vmul.f32 0.6931472, %v1038_v9 }
 0x3d7   :  { %1043 = vlog2.f32 %v792_v10  ;;  %v777_v17 = vmul.f32 %v945_v7, %v696_v11  ;;  %v721_v10 = vadd.s32 112, %v1256_v29 }
 0x3d8   :  { %v836_v19 = vadd.f32 %v835_v5, %v808_v15  ;;  %v681_v30 = vpop.trf.xlu1  ;;  %v952_v15 = vsel %vm736_vm4, 1.0, %v1093_v6 }
 0x3d9   :  { %v1040_v31 = vpop.eup %1039  ;;  %v793_v32 = vadd.f32 1.0, %v777_v17  ;;  %v697_v33 = vadd.f32 %v1222_v12, %v681_v30  ;;  %vm737_vm5 = vcmp.ne.s32.totalorder %v721_v10, %v1191_v21 }
 0x3da   :  { %v810_v14 = vmul.f32 0.6931472, %v1040_v31  ;;  %v722_v31 = vadd.s32 120, %v1256_v29  ;;  %v953_v34 = vsel %vm737_vm5, 1.0, %v1093_v6 }
 0x3db   :  { %1045 = vlog2.f32 %v793_v32  ;;  %v778_v35 = vmul.f32 %v946_v23, %v697_v33 }
 0x3dc   :  { %v837_v36 = vadd.f32 %v836_v19, %v810_v14  ;;  %v682_v20 = vpop.trf.xlu1  ;;  %vm738_vm6 = vcmp.ne.s32.totalorder %v722_v31, %v1191_v21 }
 0x3dd   :  { %v1042_v38 = vpop.eup %1041  ;;  %v794_v39 = vadd.f32 1.0, %v778_v35  ;;  %v698_v40 = vadd.f32 %v682_v20, %v1228_v18 }
 0x3de   :  { %v812_v12 = vmul.f32 0.6931472, %v1042_v38 }
 0x3df   :  { %1047 = vlog2.f32 %v794_v39  ;;  %v779_v42 = vmul.f32 %v947_v37, %v698_v40  ;;  %v954_v39 = vsel %vm738_vm6, 1.0, %v1093_v6 }
 0x3e0   :  { %v838_v43 = vadd.f32 %v837_v36, %v812_v12  ;;  %v683_v45 = vpop.trf.xlu1 }
 0x3e1   :  { %v1044_v46 = vpop.eup %1043  ;;  %v795_v47 = vadd.f32 1.0, %v779_v42  ;;  %v699_v48 = vadd.f32 %v1226_v16, %v683_v45 }
 0x3e2   :  { %v814_v18 = vmul.f32 0.6931472, %v1044_v46 }
 0x3e3   :  { %1049 = vlog2.f32 %v795_v47  ;;  %v780_v50 = vmul.f32 %v948_v44, %v699_v48 }
 0x3e4   :  { %v839_v51 = vadd.f32 %v838_v43, %v814_v18  ;;  %v684_v53 = vpop.trf.xlu1 }
 0x3e5   :  { %v1046_v54 = vpop.eup %1045  ;;  %v796_v55 = vadd.f32 1.0, %v780_v50  ;;  %v700_v56 = vadd.f32 %v684_v53, %v1234_v24 }
 0x3e6   :  { %v816_v16 = vmul.f32 0.6931472, %v1046_v54 }
 0x3e7   :  { %1051 = vlog2.f32 %v796_v55  ;;  %v781_v58 = vmul.f32 %v949_v52, %v700_v56 }
 0x3e8   :  { %v840_v59 = vadd.f32 %v839_v51, %v816_v16  ;;  %v685_v61 = vpop.trf.xlu1 }
 0x3e9   :  { %v1048_v62 = vpop.eup %1047  ;;  %v797_v63 = vadd.f32 1.0, %v781_v58  ;;  %v701_v0 = vadd.f32 %v1232_v22, %v685_v61 }
 0x3ea   :  { %v818_v24 = vmul.f32 0.6931472, %v1048_v62 }
 0x3eb   :  { %1053 = vlog2.f32 %v797_v63  ;;  %v782_v2 = vmul.f32 %v950_v60, %v701_v0  ;;  %v865_v60 = vstv %s864_s18  ;;  %v641_v63 = vstv %s1015_s19 }
 0x3ec   :  { %v841_v3 = vadd.f32 %v840_v59, %v818_v24  ;;  %v686_v5 = vpop.trf.xlu1  ;;  %v861_v59 = vstv %s860_s17 }
 0x3ed   :  { %v1050_v7 = vpop.eup %1049  ;;  %v798_v8 = vadd.f32 1.0, %v782_v2  ;;  %v702_v9 = vadd.f32 %v686_v5, %v1238_v26 }
 0x3ee   :  { %v820_v22 = vmul.f32 0.6931472, %v1050_v7 }
 0x3ef   :  { %1055 = vlog2.f32 %v798_v8  ;;  %v783_v11 = vmul.f32 %v951_v4, %v702_v9 }
 0x3f0   :  { %v842_v13 = vadd.f32 %v841_v3, %v820_v22  ;;  %v687_v17 = vpop.trf.xlu1 }
 0x3f1   :  { %v1052_v19 = vpop.eup %1051  ;;  %v799_v23 = vadd.f32 1.0, %v783_v11  ;;  %v703_v30 = vadd.f32 %v1236_v25, %v687_v17 }
 0x3f2   :  { %v822_v26 = vmul.f32 0.6931472, %v1052_v19 }
 0x3f3   :  { %1057 = vlog2.f32 %v799_v23  ;;  %v784_v32 = vmul.f32 %v952_v15, %v703_v30 }
 0x3f4   :  { %v843_v33 = vadd.f32 %v842_v13, %v822_v26  ;;  %v688_v14 = vpop.trf.xlu1 }
 0x3f5   :  { %v1054_v35 = vpop.eup %1053  ;;  %v800_v36 = vadd.f32 1.0, %v784_v32  ;;  %v704_v37 = vadd.f32 %v688_v14, %v1242_v28 }
 0x3f6   :  { %v824_v20 = vmul.f32 0.6931472, %v1054_v35 }
 0x3f7   :  { %1059 = vlog2.f32 %v800_v36  ;;  %v785_v25 = vmul.f32 %v953_v34, %v704_v37 }
 0x3f8   :  { %v844_v38 = vadd.f32 %v843_v33, %v824_v20  ;;  %v689_v29 = vpop.trf.xlu1 }
 0x3f9   :  { %v1056_v40 = vpop.eup %1055  ;;  %v801_v41 = vadd.f32 1.0, %v785_v25  ;;  %v705_v12 = vadd.f32 %v1240_v27, %v689_v29 }
 0x3fa   :  { %v826_v42 = vmul.f32 0.6931472, %v1056_v40 }
 0x3fb   :  { %1061 = vlog2.f32 %v801_v41  ;;  %v786_v43 = vmul.f32 %v954_v39, %v705_v12 }
 0x3fc   :  { %v845_v44 = vadd.f32 %v844_v38, %v826_v42 }
 0x3fd   :  { %v1058_v45 = vpop.eup %1057  ;;  %v802_v46 = vadd.f32 1.0, %v786_v43 }
 0x3fe   :  { %v828_v28 = vmul.f32 0.6931472, %v1058_v45 }
 0x3ff   :  { %1063 = vlog2.f32 %v802_v46 }
 0x400   :  { %v846_v21 = vadd.f32 %v845_v44, %v828_v28  ;;  %1065 = vrcp.f32 %v861_v59 }
 0x401   :  { %v1060_v47 = vpop.eup %1059  ;;  %1067 = vrcp.f32 %v865_v60 }
 0x402   :  { %v830_v48 = vmul.f32 0.6931472, %v1060_v47 }
 0x404   :  { %v847_v49 = vadd.f32 %v846_v21, %v830_v48 }
 0x405   :  { %v1062_v18 = vpop.eup %1061 }
 0x406   :  { %v832_v50 = vmul.f32 0.6931472, %v1062_v18 }
 0x408   :  { %v848_v6 = vadd.f32 %v847_v49, %v832_v50 }
 0x409   :  { %v1064_v51 = vpop.eup %1063 }
 0x40a   :  { %v834_v52 = vmul.f32 0.6931472, %v1064_v51  ;;  %v1066_v61 = vpop.eup %1065 }
 0x40b   :  { %v1068_v62 = vpop.eup %1067  ;;  %v863_v1 = vmul.f32 %v1066_v61, %v641_v63 }
 0x40c   :  { %v849_v53 = vadd.f32 %v848_v6, %v834_v52 }
 0x40e   :  { %850 = vadd.xlane.f32.xlu1 %v849_v53 }
 0x49b   :  { %v851_v27 = vpop.xlane.xlu1 %850 }
 0x49c   :  { %v852_v54 = vrot.slane %v851_v27, 4 }
 0x49e   :  { %v853_v55 = vadd.f32 %v852_v54, %v851_v27 }
 0x4a0   :  { %v854_v56 = vrot.slane %v853_v55, 2 }
 0x4a2   :  { %v855_v57 = vadd.f32 %v854_v56, %v853_v55 }
 0x4a4   :  { %v856_v16 = vrot.slane %v855_v57, 1 }
 0x4a6   :  { %v857_v58 = vadd.f32 %v856_v16, %v855_v57 }
 0x4a8   :  { %1016 = vpush %v857_v58 }
 0x4d9   :  { %s1017_s20 = spop %1016 }
 0x4da   :  { %v859_v0 = vstv %s1017_s20 }
 0x4db   :  { %v867_v24 = vmul.f32 %v1068_v62, %v859_v0 }
 0x4dd   :  { %v868_v2 = vadd.f32 %v867_v24, %v863_v1 }
 0x4df   :  { %870 = vst.msk [vmem:[#allocation8] sm:$0x1] %vm869_vm7, %v868_v2 }
 0x4e0   :  { %1080 = shalt.err (!%p1077_p7)
}
 0x4e1   :  { %s1081_s26 = scalar_lea.hbm %s1341_s9, 16 }
 0x4e2   :  { %p1082_p8 = scmp.ne.s32.totalorder %s1341_s9, %s1081_s26  ;;  %p1085_p9 = scmp.lt.u32.totalorder %s1081_s26, %s1341_s9 }
 0x4e4   :  { %p1087_p10 = pnand %p1085_p9, %p1082_p8 }
 0x4e6   :  { %1090 = shalt.err (!%p1087_p10)
}
 0x4e7   :  { %880 = dma.vmem_to_hbm [thread:$0]  %s878_s22, 16, %s1341_s9, [#allocation9]  }
 0x4e8   :  { %1091 = dma.done.wait [#allocation9], 16  }
 0x4e9   :  { %1092 = vsyncadd [#allocation9], 4294967280 }
 0x4ea   :  { %884 = vsyncpa [#allocation9], 1 }

</bundles_post_ra>
